<compile_context>
chip_gen: v6e
topology: v6e:2x2x1
jax: 0.10.0
libtpu: 0.0.40
codegen_flags: <defaults>
</compile_context>

<pallas_src>
import jax
import jax.numpy as jnp
from jax.experimental import pallas as pl
from jax.experimental.pallas import tpu as pltpu

IMAGE_SIZE = 24
IN_DIM = IMAGE_SIZE * IMAGE_SIZE   # 576
H1 = 128
H2 = 64
NUM_CLASSES = 369                  # HASYv2 symbol count (deterministic, synthetic)
C_PAD = 384                        # NUM_CLASSES rounded up to a multiple of 128


def _round_up(n, m):
    return ((n + m - 1) // m) * m


def mlp_kernel(x_ref, w1_ref, b1_ref, w2_ref, b2_ref, w3_ref, b3_ref, o_ref):
    # Fused 3-layer MLP for one batch tile.
    # bf16 operands on the MXU, f32 accumulation; bias-add/ReLU in f32 on the VPU.
    x = x_ref[...]                                                     # bf16 (bb, 576)
    h1 = jnp.dot(x, w1_ref[...], preferred_element_type=jnp.float32) + b1_ref[...]
    h1 = jnp.maximum(h1, 0.0).astype(jnp.bfloat16)                     # (bb, 128)
    h2 = jnp.dot(h1, w2_ref[...], preferred_element_type=jnp.float32) + b2_ref[...]
    h2 = jnp.maximum(h2, 0.0).astype(jnp.bfloat16)                     # (bb, 64)
    out = jnp.dot(h2, w3_ref[...], preferred_element_type=jnp.float32) + b3_ref[...]
    o_ref[...] = out.astype(o_ref.dtype)                               # (bb, 384) f32


def mlp_forward(x, w1, b1, w2, b2, w3, b3, *, block_b=256):
    """x: (B, H, W) or (B, D) float32. Weights stored as (in, out). Returns (B, NUM_CLASSES)."""
    B = x.shape[0]
    x2d = x.reshape(B, -1)
    assert x2d.shape[1] == IN_DIM

    # --- operand preparation (wrapper-side, outside the kernel) ---
    # bf16 matmul operands; f32 biases kept 2D (1, N) for clean TPU layout.
    xb = x2d.astype(jnp.bfloat16)
    w1b = w1.astype(jnp.bfloat16)
    w2b = w2.astype(jnp.bfloat16)
    # Pad the class dim to a multiple of 128 -> lane-dense output stores.
    w3p = jnp.zeros((H2, C_PAD), jnp.bfloat16).at[:, :NUM_CLASSES].set(
        w3.astype(jnp.bfloat16))
    b1r = b1.reshape(1, H1).astype(jnp.float32)
    b2r = b2.reshape(1, H2).astype(jnp.float32)
    b3r = jnp.zeros((1, C_PAD), jnp.float32).at[0, :NUM_CLASSES].set(
        b3.astype(jnp.float32))

    # --- batch tiling: big tiles for MXU occupancy, clamped for small demos ---
    block_b = max(8, min(_round_up(block_b, 8), _round_up(B, 8)))
    Bp = _round_up(B, block_b)
    if Bp != B:
        xb = jnp.pad(xb, ((0, Bp - B), (0, 0)))

    grid = (Bp // block_b,)
    out = pl.pallas_call(
        mlp_kernel,
        out_shape=jax.ShapeDtypeStruct((Bp, C_PAD), jnp.float32),
        grid_spec=pltpu.PrefetchScalarGridSpec(
            num_scalar_prefetch=0,
            grid=grid,
            in_specs=[
                pl.BlockSpec((block_b, IN_DIM), lambda i: (i, 0)),   # x tile (streams)
                pl.BlockSpec((IN_DIM, H1), lambda i: (0, 0)),        # w1 (resident)
                pl.BlockSpec((1, H1), lambda i: (0, 0)),             # b1
                pl.BlockSpec((H1, H2), lambda i: (0, 0)),            # w2
                pl.BlockSpec((1, H2), lambda i: (0, 0)),             # b2
                pl.BlockSpec((H2, C_PAD), lambda i: (0, 0)),         # w3 (padded)
                pl.BlockSpec((1, C_PAD), lambda i: (0, 0)),          # b3 (padded)
            ],
            out_specs=pl.BlockSpec((block_b, C_PAD), lambda i: (i, 0)),
        ),
        compiler_params=pltpu.CompilerParams(
            dimension_semantics=("parallel",),      # shards grid across TCs on v7x
        ),
    )(xb, w1b, b1r, w2b, b2r, w3p, b3r)

    return out[:B, :NUM_CLASSES]


def _init_linear(key, fan_in, fan_out):
    # Deterministic init mirroring nn.Linear's uniform(-1/sqrt(fan_in), 1/sqrt(fan_in)),
    # stored as (in, out) for the x @ W convention.
    kw, kb = jax.random.split(key)
    bound = 1.0 / jnp.sqrt(fan_in)
    w = jax.random.uniform(kw, (fan_in, fan_out), jnp.float32, -bound, bound)
    b = jax.random.uniform(kb, (fan_out,), jnp.float32, -bound, bound)
    return w, b


if __name__ == "__main__":
    key = jax.random.PRNGKey(0)
    k_x, k1, k2, k3 = jax.random.split(key, 4)

    B = 16
    x = jax.random.normal(k_x, (B, IMAGE_SIZE, IMAGE_SIZE), jnp.float32)

    w1, b1 = _init_linear(k1, IN_DIM, H1)
    w2, b2 = _init_linear(k2, H1, H2)
    w3, b3 = _init_linear(k3, H2, NUM_CLASSES)

    out = mlp_forward(x, w1, b1, w2, b2, w3, b3)
    out = jax.block_until_ready(out)
    assert out.shape == (B, NUM_CLASSES)

    # Reference 1: identical bf16-operand / f32-accumulate math (tight tolerance).
    xf = x.reshape(B, -1).astype(jnp.bfloat16)
    h1 = jnp.maximum(
        jnp.dot(xf, w1.astype(jnp.bfloat16), preferred_element_type=jnp.float32) + b1, 0.0
    ).astype(jnp.bfloat16)
    h2 = jnp.maximum(
        jnp.dot(h1, w2.astype(jnp.bfloat16), preferred_element_type=jnp.float32) + b2, 0.0
    ).astype(jnp.bfloat16)
    ref_bf16 = jnp.dot(h2, w3.astype(jnp.bfloat16), preferred_element_type=jnp.float32) + b3
    assert jnp.allclose(out, ref_bf16, atol=2e-3, rtol=2e-3), "mismatch vs bf16 reference"

    # Reference 2: full f32 math (loose tolerance; bounds bf16 rounding error).
    xf32 = x.reshape(B, -1)
    ref = jnp.maximum(xf32 @ w1 + b1, 0.0)
    ref = jnp.maximum(ref @ w2 + b2, 0.0)
    ref = ref @ w3 + b3
    assert jnp.allclose(out, ref, atol=5e-2, rtol=5e-2), "mismatch vs f32 reference"

    print("KERNEL_OK")
</pallas_src>

<mosaic_0001>
module attributes {stable_mosaic.version = 11 : i64} {
  func.func @mlp_kernel(%arg0: i32, %arg1: memref<16x576xbf16, #tpu.memory_space<vmem>>, %arg2: memref<576x128xbf16, #tpu.memory_space<vmem>>, %arg3: memref<1x128xf32, #tpu.memory_space<vmem>>, %arg4: memref<128x64xbf16, #tpu.memory_space<vmem>>, %arg5: memref<1x64xf32, #tpu.memory_space<vmem>>, %arg6: memref<64x384xbf16, #tpu.memory_space<vmem>>, %arg7: memref<1x384xf32, #tpu.memory_space<vmem>>, %arg8: memref<16x384xf32, #tpu.memory_space<vmem>>) attributes {dimension_semantics = [#tpu.dimension_semantics<parallel>], iteration_bounds = array<i64: 1>, scalar_prefetch = 0 : i64, scratch_operands = 0 : i64, tpu.core_type = #tpu.core_type<tc>, window_params = [{transform_indices = @transform_0, window_bounds = array<i64: 16, 576>}, {pipeline_mode = #tpu.pipeline_mode<synchronous>, transform_indices = @transform_1, window_bounds = array<i64: 576, 128>}, {pipeline_mode = #tpu.pipeline_mode<synchronous>, transform_indices = @transform_2, window_bounds = array<i64: 1, 128>}, {pipeline_mode = #tpu.pipeline_mode<synchronous>, transform_indices = @transform_3, window_bounds = array<i64: 128, 64>}, {pipeline_mode = #tpu.pipeline_mode<synchronous>, transform_indices = @transform_4, window_bounds = array<i64: 1, 64>}, {pipeline_mode = #tpu.pipeline_mode<synchronous>, transform_indices = @transform_5, window_bounds = array<i64: 64, 384>}, {pipeline_mode = #tpu.pipeline_mode<synchronous>, transform_indices = @transform_6, window_bounds = array<i64: 1, 384>}, {transform_indices = @transform_7, window_bounds = array<i64: 16, 384>}]} {
    %c0 = arith.constant 0 : index
    %c0_0 = arith.constant 0 : index
    %0 = vector.load %arg1[%c0, %c0_0] : memref<16x576xbf16, #tpu.memory_space<vmem>>, vector<16x576xbf16>
    %c0_1 = arith.constant 0 : index
    %c0_2 = arith.constant 0 : index
    %1 = vector.load %arg2[%c0_1, %c0_2] : memref<576x128xbf16, #tpu.memory_space<vmem>>, vector<576x128xbf16>
    %cst = arith.constant dense<0.000000e+00> : vector<16x128xf32>
    %2 = tpu.matmul %0, %1, %cst {dimension_numbers = #tpu.dot_dimension_numbers<[1], [0], [0], [1], [0, 0, 1, 1], [], []>} : vector<16x576xbf16>, vector<576x128xbf16>, vector<16x128xf32> -> vector<16x128xf32>
    %c0_3 = arith.constant 0 : index
    %c0_4 = arith.constant 0 : index
    %3 = vector.load %arg3[%c0_3, %c0_4] : memref<1x128xf32, #tpu.memory_space<vmem>>, vector<1x128xf32>
    %4 = vector.broadcast %3 : vector<1x128xf32> to vector<16x128xf32>
    %5 = arith.addf %2, %4 : vector<16x128xf32>
    %cst_5 = arith.constant 0.000000e+00 : f32
    %6 = vector.broadcast %cst_5 : f32 to vector<16x128xf32>
    %7 = arith.maximumf %5, %6 : vector<16x128xf32>
    %8 = arith.truncf %7 : vector<16x128xf32> to vector<16x128xbf16>
    %c0_6 = arith.constant 0 : index
    %c0_7 = arith.constant 0 : index
    %9 = vector.load %arg4[%c0_6, %c0_7] : memref<128x64xbf16, #tpu.memory_space<vmem>>, vector<128x64xbf16>
    %cst_8 = arith.constant dense<0.000000e+00> : vector<16x64xf32>
    %10 = tpu.matmul %8, %9, %cst_8 {dimension_numbers = #tpu.dot_dimension_numbers<[1], [0], [0], [1], [0, 0, 1, 1], [], []>} : vector<16x128xbf16>, vector<128x64xbf16>, vector<16x64xf32> -> vector<16x64xf32>
    %c0_9 = arith.constant 0 : index
    %c0_10 = arith.constant 0 : index
    %11 = vector.load %arg5[%c0_9, %c0_10] : memref<1x64xf32, #tpu.memory_space<vmem>>, vector<1x64xf32>
    %12 = vector.broadcast %11 : vector<1x64xf32> to vector<16x64xf32>
    %13 = arith.addf %10, %12 : vector<16x64xf32>
    %cst_11 = arith.constant 0.000000e+00 : f32
    %14 = vector.broadcast %cst_11 : f32 to vector<16x64xf32>
    %15 = arith.maximumf %13, %14 : vector<16x64xf32>
    %16 = arith.truncf %15 : vector<16x64xf32> to vector<16x64xbf16>
    %c0_12 = arith.constant 0 : index
    %c0_13 = arith.constant 0 : index
    %17 = vector.load %arg6[%c0_12, %c0_13] : memref<64x384xbf16, #tpu.memory_space<vmem>>, vector<64x384xbf16>
    %cst_14 = arith.constant dense<0.000000e+00> : vector<16x384xf32>
    %18 = tpu.matmul %16, %17, %cst_14 {dimension_numbers = #tpu.dot_dimension_numbers<[1], [0], [0], [1], [0, 0, 1, 1], [], []>} : vector<16x64xbf16>, vector<64x384xbf16>, vector<16x384xf32> -> vector<16x384xf32>
    %c0_15 = arith.constant 0 : index
    %c0_16 = arith.constant 0 : index
    %19 = vector.load %arg7[%c0_15, %c0_16] : memref<1x384xf32, #tpu.memory_space<vmem>>, vector<1x384xf32>
    %20 = vector.broadcast %19 : vector<1x384xf32> to vector<16x384xf32>
    %21 = arith.addf %18, %20 : vector<16x384xf32>
    %c0_17 = arith.constant 0 : index
    %c0_18 = arith.constant 0 : index
    %22 = vector.load %arg8[%c0_17, %c0_18] : memref<16x384xf32, #tpu.memory_space<vmem>>, vector<16x384xf32>
    tpu.vector_store %arg8[%c0_17, %c0_18], %21 {strides = array<i32>} : memref<16x384xf32, #tpu.memory_space<vmem>>, vector<16x384xf32>,
    return
  }
  func.func @transform_0(%arg0: i32) -> (i32, i32) {
    %c0_i32 = arith.constant 0 : i32
    %c0_i32_0 = arith.constant 0 : i32
    return %arg0, %c0_i32 : i32, i32
  }
  func.func @transform_1(%arg0: i32) -> (i32, i32) {
    %c0_i32 = arith.constant 0 : i32
    %c0_i32_0 = arith.constant 0 : i32
    %c0_i32_1 = arith.constant 0 : i32
    return %c0_i32, %c0_i32_0 : i32, i32
  }
  func.func @transform_2(%arg0: i32) -> (i32, i32) {
    %c0_i32 = arith.constant 0 : i32
    %c0_i32_0 = arith.constant 0 : i32
    %c0_i32_1 = arith.constant 0 : i32
    return %c0_i32, %c0_i32_0 : i32, i32
  }
  func.func @transform_3(%arg0: i32) -> (i32, i32) {
    %c0_i32 = arith.constant 0 : i32
    %c0_i32_0 = arith.constant 0 : i32
    %c0_i32_1 = arith.constant 0 : i32
    return %c0_i32, %c0_i32_0 : i32, i32
  }
  func.func @transform_4(%arg0: i32) -> (i32, i32) {
    %c0_i32 = arith.constant 0 : i32
    %c0_i32_0 = arith.constant 0 : i32
    %c0_i32_1 = arith.constant 0 : i32
    return %c0_i32, %c0_i32_0 : i32, i32
  }
  func.func @transform_5(%arg0: i32) -> (i32, i32) {
    %c0_i32 = arith.constant 0 : i32
    %c0_i32_0 = arith.constant 0 : i32
    %c0_i32_1 = arith.constant 0 : i32
    return %c0_i32, %c0_i32_0 : i32, i32
  }
  func.func @transform_6(%arg0: i32) -> (i32, i32) {
    %c0_i32 = arith.constant 0 : i32
    %c0_i32_0 = arith.constant 0 : i32
    %c0_i32_1 = arith.constant 0 : i32
    return %c0_i32, %c0_i32_0 : i32, i32
  }
  func.func @transform_7(%arg0: i32) -> (i32, i32) {
    %c0_i32 = arith.constant 0 : i32
    %c0_i32_0 = arith.constant 0 : i32
    return %arg0, %c0_i32 : i32, i32
  }
}

</mosaic_0001>

<bundles_post_ra>
// kernel: tpu_custom_call.1
= control target key start
LH: loop header
LB: loop body
LE: loop exit
PB: predicated region body
PF: predicated region fallthrough
CT: control target
= control target key end

     0   :  { %12 = vsyncpa [#allocation3], 0  ;;  %s1308_s0 = inlined_call_operand.hbm [shape: bf16[16,576], index: 0, kind: input, shape index: {}]   ;;  %s1309_s1 = inlined_call_operand.hbm [shape: bf16[576,128], index: 1, kind: input, shape index: {}]   ;;  %s1310_s2 = inlined_call_operand.vmem [shape: f32[1,128], index: 2, kind: input, shape index: {}]   ;;  %s1311_s3 = inlined_call_operand.vmem [shape: bf16[128,64], index: 3, kind: input, shape index: {}]   ;;  %s1312_s4 = inlined_call_operand.vmem [shape: f32[1,64], index: 4, kind: input, shape index: {}]   ;;  %s1313_s5 = inlined_call_operand.vmem [shape: bf16[64,384], index: 5, kind: input, shape index: {}]   ;;  %s1314_s6 = inlined_call_operand.vmem [shape: f32[1,384], index: 6, kind: input, shape index: {}]   ;;  %s1315_s7 = inlined_call_operand.hbm [shape: f32[16,384], index: 7, kind: output, shape index: {}]  }
   0x1   :  { %13 = vsyncpa [#allocation6], 0 }
   0x2   :  { %14 = vsyncpa [#allocation4], 0  ;;  %s1153_s24 = smov [#allocation2]  }
   0x3   :  { %s20_s25 = sshll.u32 %s1153_s24, 4  ;;  %s21_s25 = int_to_ptr.vmem [resolvable:$true] %s20_s25 }
   0x4   :  { %s1095_s26 = scalar_lea.vmem %s21_s25, 640  ;;  %p1100_p1 = scmp.lt.s32.totalorder %s21_s25, %s21_s25 }
   0x5   :  { %p1096_p0 = scmp.ne.s32.totalorder %s21_s25, %s1095_s26  ;;  %p1101_p2 = scmp.lt.s32.totalorder %s1095_s26, %s1095_s26 }
   0x7   :  { %p1102_p3 = por %p1101_p2, %p1100_p1 }
   0x9   :  { %p1103_p4 = pnand %p1102_p3, %p1096_p0 }
   0xb   :  { %1106 = shalt.err (!%p1103_p4)
}
   0xc   :  { %s1154_s27 = smov 320   ;;  %s1155_s28 = smov 20  }
   0xd   :  { %26 = dma.hbm_to_vmem [thread:$0]  %s1308_s0, 640, %s21_s25, [#allocation3], %s1154_s27, %s1154_s27, %s1155_s28  }
   0xe   :  { %s1156_s8 = smov [#allocation5]  }
   0xf   :  { %s32_s9 = sshll.u32 %s1156_s8, 4  ;;  %s33_s9 = int_to_ptr.vmem [resolvable:$true] %s32_s9 }
  0x10   :  { %s1115_s10 = scalar_lea.vmem %s33_s9, 4608  ;;  %p1120_p6 = scmp.lt.s32.totalorder %s33_s9, %s33_s9 }
  0x11   :  { %p1116_p5 = scmp.ne.s32.totalorder %s33_s9, %s1115_s10  ;;  %p1121_p7 = scmp.lt.s32.totalorder %s1115_s10, %s1115_s10 }
  0x13   :  { %p1122_p8 = por %p1121_p7, %p1120_p6 }
  0x15   :  { %p1123_p9 = pnand %p1122_p8, %p1116_p5 }
  0x17   :  { %1126 = shalt.err (!%p1123_p9)
}
  0x18   :  { %s1157_s11 = smov 64   ;;  %s1158_s12 = smov 4  }
  0x19   :  { %38 = dma.hbm_to_vmem [thread:$0]  %s1309_s1, 4608, %s33_s9, [#allocation6], %s1157_s11, %s1157_s11, %s1158_s12  }
  0x1a   :  { %1147 = dma.done.wait [#allocation3], 640  }
  0x1b   :  { %1148 = vsyncadd [#allocation3], 4294966656 }
  0x1c   :  { %1149 = dma.done.wait [#allocation6], 4608  }
  0x1d   :  { %1150 = vsyncadd [#allocation6], 4294962688  ;;  %v1020_v0 = vld [vmem:[#allocation5 + $0x78] sm:$0xff]   ;;  %v1024_v4 = vld [vmem:[#allocation5 + $0x70] sm:$0xff]   ;;  %v1159_v33 = vmov 0.0   ;;  %vm1160_vm0 = vmmov 0  }
  0x1e   :  { %v1021_v1 = vld [vmem:[#allocation5 + $0x38] sm:$0xff]   ;;  %901 = vmatprep.subr.bf16.mxu0 %v1020_v0  ;;  %v1025_v5 = vld [vmem:[#allocation5 + $0x30] sm:$0xff]   ;;  %v1028_v8 = vld [vmem:[#allocation5 + $0x68] sm:$0xff]   ;;  %vm382_vm1 = vcmask 523264  }
  0x1f   :  { %v1022_v2 = vld [vmem:[#allocation5 + $0xf8] sm:$0xff]   ;;  %902 = vmatpush3.bf16.msra.mxu0 %v1021_v1  ;;  %v1026_v6 = vld [vmem:[#allocation5 + $0xf0] sm:$0xff]   ;;  %v1029_v9 = vld [vmem:[#allocation5 + $0x28] sm:$0xff]  }
  0x20   :  { %v1023_v3 = vld [vmem:[#allocation5 + $0xb8] sm:$0xff]   ;;  %923 = vmatprep.subr.bf16.mxu1 %v1022_v2  ;;  %903 = vmatprep.subr.bf16.mxu0 %v1024_v4  ;;  %v1027_v7 = vld [vmem:[#allocation5 + $0xb0] sm:$0xff]   ;;  %v1030_v10 = vld [vmem:[#allocation5 + $0xe8] sm:$0xff]  }
  0x21   :  { %924 = vmatpush3.bf16.msra.mxu1 %v1023_v3  ;;  %v1031_v11 = vld [vmem:[#allocation5 + $0xa8] sm:$0xff]   ;;  %v1032_v12 = vld [vmem:[#allocation5 + $0x60] sm:$0xff]   ;;  %v1036_v16 = vld [vmem:[#allocation5 + $0x58] sm:$0xff]  }
  0x22   :  { %925 = vmatprep.subr.bf16.mxu1 %v1026_v6  ;;  %v1033_v13 = vld [vmem:[#allocation5 + $0x20] sm:$0xff]   ;;  %v1037_v17 = vld [vmem:[#allocation5 + $0x18] sm:$0xff]   ;;  %v1040_v20 = vld [vmem:[#allocation5 + $0x50] sm:$0xff]  }
  0x23   :  { %904 = vmatpush3.bf16.msra.mxu0 %v1025_v5  ;;  %v1034_v14 = vld [vmem:[#allocation5 + $0xe0] sm:$0xff]   ;;  %v1038_v18 = vld [vmem:[#allocation5 + $0xd8] sm:$0xff]   ;;  %v1041_v21 = vld [vmem:[#allocation5 + $0x10] sm:$0xff]  }
  0x24   :  { %905 = vmatprep.subr.bf16.mxu0 %v1028_v8  ;;  %v1035_v15 = vld [vmem:[#allocation5 + $0xa0] sm:$0xff]   ;;  %v1039_v19 = vld [vmem:[#allocation5 + $0x98] sm:$0xff]   ;;  %v1042_v22 = vld [vmem:[#allocation5 + $0xd0] sm:$0xff]  }
  0x25   :  { %926 = vmatpush3.bf16.msra.mxu1 %v1027_v7  ;;  %v1043_v23 = vld [vmem:[#allocation5 + $0x90] sm:$0xff]   ;;  %v1044_v24 = vld [vmem:[#allocation5 + $0x48] sm:$0xff]   ;;  %v1048_v28 = vld [vmem:[#allocation5 + $0x40] sm:$0xff]  }
  0x26   :  { %927 = vmatprep.subr.bf16.mxu1 %v1030_v10  ;;  %v1045_v25 = vld [vmem:[#allocation5 + $0x8] sm:$0xff]   ;;  %v1049_v29 = vld [vmem:[#allocation5] sm:$0xff]   ;;  %v1053_v32 = vld [vmem:[#allocation2 + $0x4] ss:$20 sps:$4 sm:$0xff]  }
  0x27   :  { %906 = vmatpush3.bf16.msra.mxu0 %v1029_v9  ;;  %v1046_v26 = vld [vmem:[#allocation5 + $0xc8] sm:$0xff]   ;;  %v1050_v30 = vld [vmem:[#allocation5 + $0xc0] sm:$0xff]   ;;  %418 = vmatprep.mubr.bf16.mxu0 %v1053_v32  ;;  %v1058_v37 = vld [vmem:[#allocation5 + $0x118] sm:$0xff]  }
  0x28   :  { %907 = vmatprep.subr.bf16.mxu0 %v1032_v12  ;;  %v1047_v27 = vld [vmem:[#allocation5 + $0x88] sm:$0xff]   ;;  %v1054_v34 = vld [vmem:[#allocation5 + $0x80] sm:$0xff]   ;;  %v1059_v38 = vld [vmem:[#allocation5 + $0x110] sm:$0xff]  }
  0x29   :  { %928 = vmatpush3.bf16.msra.mxu1 %v1031_v11  ;;  %v1051_v31 = vld [vmem:[#allocation2] ss:$20 sps:$4 sm:$0xff]   ;;  %v1055_v35 = vld [vmem:[#allocation2 + $0x8] ss:$20 sps:$4 sm:$0xff]   ;;  %v1062_v42 = vld [vmem:[#allocation2 + $0x10] ss:$20 sps:$4 sm:$0xff]  }
  0x2a   :  { %929 = vmatprep.subr.bf16.mxu1 %v1034_v14  ;;  %v1057_v36 = vld [vmem:[#allocation2 + $0xc] ss:$20 sps:$4 sm:$0xff]   ;;  %v1060_v39 = vld [vmem:[#allocation5 + $0x108] sm:$0xff]   ;;  %v1063_v40 = vld [vmem:[%s1311_s3 + $0x38] sm:$0xff]  }
  0x2b   :  { %908 = vmatpush3.bf16.msra.mxu0 %v1033_v13  ;;  %459 = vmatprep.mubr.bf16.mxu1 %v1057_v36  ;;  %v1061_v41 = vld [vmem:[#allocation5 + $0x100] sm:$0xff]   ;;  %v1064_v43 = vld [vmem:[%s1311_s3 + $0x30] sm:$0xff]   ;;  %v1066_v45 = vld [vmem:[%s1311_s3 + $0x20] sm:$0xff]   ;;  %v645_v36 = vlaneseq }
  0x2c   :  { %909 = vmatprep.subr.bf16.mxu0 %v1036_v16  ;;  %v1065_v44 = vld [vmem:[%s1311_s3 + $0x28] sm:$0xff]   ;;  %v1067_v46 = vld [vmem:[%s1311_s3 + $0x18] sm:$0xff]   ;;  %v1068_v47 = vld [vmem:[%s1311_s3 + $0x10] sm:$0xff]  }
  0x2d   :  { %930 = vmatpush3.bf16.msra.mxu1 %v1035_v15  ;;  %v1069_v48 = vld [vmem:[%s1311_s3 + $0x8] sm:$0xff]   ;;  %v1070_v49 = vld [vmem:[%s1311_s3] sm:$0xff]   ;;  %v1074_v53 = vld [vmem:[%s1313_s5 + $0x30] ss:$12 sps:$4 sm:$0xff]  }
  0x2e   :  { %931 = vmatprep.subr.bf16.mxu1 %v1038_v18  ;;  %v1071_v50 = vld [vmem:[%s1313_s5 + $0x48] ss:$12 sps:$4 sm:$0xff]   ;;  %v1073_v51 = vld [vmem:[%s1313_s5 + $0x4c] ss:$12 sps:$4 sm:$0xff]   ;;  %v835_v62 = vld [vmem:[%s1310_s2] ss:$0 sm:$0xff] }
  0x2f   :  { %910 = vmatpush3.bf16.msra.mxu0 %v1037_v17  ;;  %v1076_v52 = vld [vmem:[%s1313_s5 + $0x34] ss:$12 sps:$4 sm:$0xff]   ;;  %v1079_v16 = vld [vmem:[%s1313_s5 + $0x1c] ss:$12 sps:$4 sm:$0xff]   ;;  %v1077_v17 = vld [vmem:[%s1313_s5 + $0x18] ss:$12 sps:$4 sm:$0xff]  }
  0x30   :  { %911 = vmatprep.subr.bf16.mxu0 %v1040_v20  ;;  %v1082_v18 = vld [vmem:[%s1313_s5 + $0x4] ss:$12 sps:$4 sm:$0xff]   ;;  %v1161_v20 = vmov 0  }
  0x31   :  { %932 = vmatpush3.bf16.msra.mxu1 %v1039_v19  ;;  %v1080_v19 = vld [vmem:[%s1313_s5] ss:$12 sps:$4 sm:$0xff]   ;;  %v1084_v32 = vld [vmem:[%s1313_s5 + $0x38] ss:$12 sps:$4 sm:$0xff]  }
  0x32   :  { %933 = vmatprep.subr.bf16.mxu1 %v1042_v22 }
  0x33   :  { %912 = vmatpush3.bf16.msra.mxu0 %v1041_v21  ;;  %v878_v21 = vld [vmem:[%s1312_s4] ss:$0 sm:$0xff] }
  0x34   :  { %913 = vmatprep.subr.bf16.mxu0 %v1044_v24 }
  0x35   :  { %934 = vmatpush3.bf16.msra.mxu1 %v1043_v23 }
  0x36   :  { %935 = vmatprep.subr.bf16.mxu1 %v1046_v26 }
  0x37   :  { %914 = vmatpush3.bf16.msra.mxu0 %v1045_v25 }
  0x38   :  { %915 = vmatprep.subr.bf16.mxu0 %v1048_v28 }
  0x39   :  { %936 = vmatpush3.bf16.msra.mxu1 %v1047_v27 }
  0x3a   :  { %937 = vmatprep.subr.bf16.mxu1 %v1050_v30  ;;  %v1083_v30 = vld [vmem:[%s1313_s5 + $0x50] ss:$12 sps:$4 sm:$0xff]  }
  0x3b   :  { %916 = vmatpush3.bf16.msra.mxu0 %v1049_v29 }
  0x3c   :  { %964 = vmatprep.subr.bf16.mxu0 %v1159_v33 }
  0x3d   :  { %938 = vmatpush3.bf16.msra.mxu1 %v1054_v34  ;;  %v1085_v34 = vld [vmem:[%s1313_s5 + $0x20] ss:$12 sps:$4 sm:$0xff]  }
  0x3e   :  { %419 = vmatmul.mubr.bf16.vlgmr.msra.gmra.mxu0 %v1051_v31  ;;  %976 = vmatprep.subr.bf16.mxu1 %v1159_v33 }
  0x3f   :  { %972 = vmatprep.mubr.msk.bf16.mxu0 %vm1160_vm0, %v1159_v33  ;;  %965 = vmatpush3.bf16.msra.mxu0 %v1058_v37  ;;  %v646_v37 = vshrl.u32 %v645_v36, 7 }
  0x40   :  { %460 = vmatmul.mubr.bf16.vlgmr.msra.gmra.mxu1 %v1055_v35  ;;  %966 = vmatprep.subr.bf16.mxu0 %v1159_v33  ;;  %v1086_v35 = vld [vmem:[%s1313_s5 + $0x8] ss:$12 sps:$4 sm:$0xff]   ;;  %s1162_s5 = smov [#allocation7]  }
  0x41   :  { %992 = vmatprep.mubr.msk.bf16.mxu1 %vm1160_vm0, %v1159_v33  ;;  %977 = vmatpush3.bf16.msra.mxu1 %v1063_v40  ;;  %v651_v40 = vsub.s32 1, %v646_v37 }
  0x42   :  { %978 = vmatprep.subr.bf16.mxu1 %v1159_v33 }
  0x43   :  { %967 = vmatpush3.bf16.msra.mxu0 %v1059_v38  ;;  %v647_v38 = vsub.s32 0, %v646_v37 }
  0x44   :  { %968 = vmatprep.subr.bf16.mxu0 %v1159_v33 }
  0x45   :  { %979 = vmatpush3.bf16.msra.mxu1 %v1064_v43 }
  0x46   :  { %980 = vmatprep.subr.bf16.mxu1 %v1159_v33 }
  0x47   :  { %969 = vmatpush3.bf16.msra.mxu0 %v1060_v39  ;;  %v643_v39 = vld [vmem:[%s1314_s6] sm:$0x7]  ;;  %s822_s6 = sshll.u32 %s1162_s5, 4  ;;  %s823_s6 = int_to_ptr.vmem [resolvable:$true] %s822_s6 }
  0x48   :  { %970 = vmatprep.subr.bf16.mxu0 %v1159_v33  ;;  %s1127_s8 = scalar_lea.vmem %s823_s6, 768  ;;  %p1132_p11 = scmp.lt.s32.totalorder %s823_s6, %s823_s6 }
  0x49   :  { %981 = vmatpush3.bf16.msra.mxu1 %v1065_v44  ;;  %p1128_p10 = scmp.ne.s32.totalorder %s823_s6, %s1127_s8  ;;  %p1133_p12 = scmp.lt.s32.totalorder %s1127_s8, %s1127_s8 }
  0x4a   :  { %982 = vmatprep.subr.bf16.mxu1 %v1159_v33 }
  0x4b   :  { %971 = vmatpush3.bf16.msra.mxu0 %v1061_v41  ;;  %v648_v41 = vrot.slane %v643_v39, %v647_v38  ;;  %p1134_p13 = por %p1133_p12, %p1132_p11 }
  0x4c   :  { %735 = vmatprep.subr.bf16.mxu0 %v1073_v51 }
  0x4d   :  { %983 = vmatpush3.bf16.msra.mxu1 %v1066_v45  ;;  %p1135_p0 = pnand %p1134_p13, %p1128_p10 }
  0x4e   :  { %973 = vmatmul.mubr.msk.bf16.vlgmr.msra.gmra.mxu0 %vm382_vm1, %v1062_v42  ;;  %984 = vmatprep.subr.bf16.mxu1 %v1159_v33  ;;  %v652_v42 = vrot.slane %v643_v39, %v651_v40 }
  0x4f   :  { %736 = vmatpush1.bf16.msra.mxu0 %v1071_v50  ;;  %759 = vmatprep.mubr.bf16.mxu0 %v1161_v20  ;;  %v655_v50 = vsub.s32 2, %v646_v37 }
  0x50   :  { %737 = vmatprep.subr.bf16.mxu0 %v1076_v52 }
  0x51   :  { %985 = vmatpush3.bf16.msra.mxu1 %v1067_v46  ;;  %v656_v51 = vrot.slane %v643_v39, %v655_v50 }
  0x52   :  { %986 = vmatprep.subr.bf16.mxu1 %v1159_v33 }
  0x53   :  { %738 = vmatpush1.bf16.msra.mxu0 %v1074_v53 }
  0x54   :  { %739 = vmatprep.subr.bf16.mxu0 %v1079_v16 }
  0x55   :  { %987 = vmatpush3.bf16.msra.mxu1 %v1068_v47 }
  0x56   :  { %988 = vmatprep.subr.bf16.mxu1 %v1159_v33 }
  0x57   :  { %740 = vmatpush1.bf16.msra.mxu0 %v1077_v17 }
  0x58   :  { %741 = vmatprep.subr.bf16.mxu0 %v1082_v18 }
  0x59   :  { %989 = vmatpush3.bf16.msra.mxu1 %v1069_v48 }
  0x5a   :  { %990 = vmatprep.subr.bf16.mxu1 %v1159_v33 }
  0x5b   :  { %742 = vmatpush1.bf16.msra.mxu0 %v1080_v19 }
  0x5c   :  { %996 = vmatprep.subr.bf16.mxu0 %v1159_v33 }
  0x5d   :  { %991 = vmatpush3.bf16.msra.mxu1 %v1070_v49 }
  0xfe   :  { %v917_v54 = vpop.f32.mrf.mxu0 }
 0x100   :  { %v918_v55 = vpop.f32.mrf.mxu0  ;;  %v939_v56 = vpop.f32.mrf.mxu1 }
 0x101   :  { %v919_v61 = vadd.f32 %v918_v55, %v917_v54 }
 0x102   :  { %v920_v57 = vpop.f32.mrf.mxu0  ;;  %v940_v58 = vpop.f32.mrf.mxu1 }
 0x103   :  { %v421_v1 = vadd.f32 %v919_v61, %v835_v62  ;;  %v941_v2 = vadd.f32 %v940_v58, %v939_v56 }
 0x104   :  { %v921_v59 = vpop.f32.mrf.mxu0  ;;  %v942_v60 = vpop.f32.mrf.mxu1 }
 0x105   :  { %v922_v63 = vadd.f32 %v921_v59, %v920_v57  ;;  %v462_v6 = vadd.f32 %v941_v2, %v421_v1 }
 0x106   :  { %v943_v0 = vpop.f32.mrf.mxu1 }
 0x107   :  { %v424_v3 = vadd.f32 %v922_v63, %v835_v62  ;;  %v944_v4 = vadd.f32 %v943_v0, %v942_v60 }
 0x109   :  { %v465_v9 = vadd.f32 %v944_v4, %v424_v3 }
 0x10e   :  { %v502_v5 = vpop.f32.mrf.mxu0 }
 0x10f   :  { %v503_v8 = vadd.f32 %v502_v5, %v462_v6 }
 0x110   :  { %v974_v7 = vpop.f32.mrf.mxu0 }
 0x111   :  { %v509_v13 = vmax.f32 %v503_v8, 0.0 }
 0x112   :  { %v505_v10 = vpop.f32.mrf.mxu0 }
 0x113   :  { %v506_v11 = vadd.f32 %v505_v10, %v465_v9 }
 0x114   :  { %v975_v12 = vpop.f32.mrf.mxu0 }
 0x115   :  { %v510_v14 = vmax.f32 %v506_v11, 0.0 }
 0x117   :  { %v511_v15 = vpack.c.bf16 %v510_v14, %v509_v13 }
 0x119   :  { %993 = vmatmul.mubr.bf16.vlgmr.msra.gmra.mxu1 %v511_v15 }
 0x1d9   :  { %v617_v22 = vpop.f32.mrf.mxu1 }
 0x1da   :  { %v618_v24 = vadd.f32 %v878_v21, %v617_v22 }
 0x1db   :  { %v994_v23 = vpop.f32.mrf.mxu1 }
 0x1dc   :  { %v624_v28 = vmax.f32 %v618_v24, 0.0 }
 0x1dd   :  { %v620_v25 = vpop.f32.mrf.mxu1 }
 0x1de   :  { %v621_v26 = vadd.f32 %v878_v21, %v620_v25 }
 0x1df   :  { %v995_v27 = vpop.f32.mrf.mxu1 }
 0x1e0   :  { %v625_v29 = vmax.f32 %v621_v26, 0.0 }
 0x1e2   :  { %v626_v31 = vpack.c.bf16 %v625_v29, %v624_v28 }
 0x1e4   :  { %899 = vmatmul.mubr.msk.bf16.vlgmr.msra.gmra.mxu0 %vm382_vm1, %v626_v31 }
 0x1e5   :  { %997 = vmatpush3.bf16.msra.mxu0 %v1083_v30  ;;  %1004 = vmatprep.mubr.msk.bf16.mxu0 %vm1160_vm0, %v1159_v33 }
 0x1e6   :  { %998 = vmatprep.subr.bf16.mxu0 %v1159_v33 }
 0x1e9   :  { %999 = vmatpush3.bf16.msra.mxu0 %v1084_v32 }
 0x1ea   :  { %1000 = vmatprep.subr.bf16.mxu0 %v1159_v33 }
 0x1ed   :  { %1001 = vmatpush3.bf16.msra.mxu0 %v1085_v34 }
 0x1ee   :  { %1002 = vmatprep.subr.bf16.mxu0 %v1159_v33 }
 0x1f1   :  { %1003 = vmatpush3.bf16.msra.mxu0 %v1086_v35 }
 0x1f4   :  { %1005 = vmatmul.mubr.msk.bf16.vlgmr.msra.gmra.mxu0 %vm382_vm1, %v626_v31 }
 0x2a4   :  { %v761_v43 = vpop.f32.mrf.mxu0 }
 0x2a5   :  { %v762_v44 = vadd.f32 %v761_v43, %v648_v41 }
 0x2a6   :  { %v763_v45 = vpop.f32.mrf.mxu0 }
 0x2a7   :  { %811 = vst [vmem:[#allocation7] sm:$0xff] %v762_v44  ;;  %v764_v46 = vadd.f32 %v763_v45, %v652_v42 }
 0x2a8   :  { %v765_v47 = vpop.f32.mrf.mxu0 }
 0x2a9   :  { %812 = vst [vmem:[#allocation7 + $0x8] sm:$0xff] %v764_v46  ;;  %v766_v33 = vadd.f32 %v765_v47, %v648_v41 }
 0x2aa   :  { %v767_v48 = vpop.f32.mrf.mxu0 }
 0x2ab   :  { %814 = vst [vmem:[#allocation7 + $0x18] sm:$0xff] %v766_v33  ;;  %v768_v49 = vadd.f32 %v767_v48, %v652_v42 }
 0x2ad   :  { %815 = vst [vmem:[#allocation7 + $0x20] sm:$0xff] %v768_v49 }
 0x2b4   :  { %v804_v52 = vpop.f32.mrf.mxu0 }
 0x2b5   :  { %v805_v53 = vadd.f32 %v804_v52, %v656_v51 }
 0x2b6   :  { %v1006_v54 = vpop.f32.mrf.mxu0 }
 0x2b7   :  { %813 = vst [vmem:[#allocation7 + $0x10] sm:$0xff] %v805_v53 }
 0x2b8   :  { %v807_v55 = vpop.f32.mrf.mxu0 }
 0x2b9   :  { %v808_v56 = vadd.f32 %v807_v55, %v656_v51 }
 0x2ba   :  { %v1007_v57 = vpop.f32.mrf.mxu0 }
 0x2bb   :  { %816 = vst [vmem:[#allocation7 + $0x28] sm:$0xff] %v808_v56 }
 0x2bc   :  { %1138 = shalt.err (!%p1135_p0)
}
 0x2bd   :  { %s1163_s9 = smov 384   ;;  %s1164_s10 = smov 24  }
 0x2be   :  { %828 = dma.vmem_to_hbm [thread:$0]  %s823_s6, 768, %s1315_s7, [#allocation4], %s1163_s9, %s1163_s9, %s1164_s10  }
 0x2bf   :  { %1151 = dma.done.wait [#allocation4], 768  }
 0x2c0   :  { %1152 = vsyncadd [#allocation4], 4294966528 }
 0x2c1   :  { %832 = vsyncpa [#allocation3], 1 }
 0x2c2   :  { %833 = vsyncpa [#allocation6], 1 }
 0x2c3   :  { %834 = vsyncpa [#allocation4], 1 }

</bundles_post_ra>
